<compile_context>
chip_gen: v5e
topology: v5e:2x2
jax: 0.10.0
libtpu: 0.0.40
codegen_flags: <defaults>
</compile_context>

<pallas_src>
import functools
import math

import jax
import jax.numpy as jnp
from jax.experimental import pallas as pl
from jax.experimental.pallas import tpu as pltpu

_INV_SQRT2 = 1.0 / math.sqrt(2.0)


def _round_up(x, m):
    return ((x + m - 1) // m) * m


# ---------------------------------------------------------------------------
# Kernel body
# ---------------------------------------------------------------------------
def _ffn_kernel(x_ref, w1_ref, b1_ref, w2_ref, b2_ref, o_ref, acc_ref,
                *, approximate_gelu):
    """One (tm, F_p) row tile x one hidden-dim tile of width th.

    x_ref : (tm, F_p) f32   (resident across the whole H axis; cast to bf16
                             in-kernel so the wrapper never materializes a
                             bf16 copy of x in HBM)
    w1_ref: (F_p, th) bf16    b1_ref: (1, th)  f32
    w2_ref: (th, F_p) bf16    b2_ref: (1, F_p) f32
    o_ref : (tm, F_p) out dtype
    acc_ref: (tm, F_p) f32 scratch accumulator (persists across the H axis)
    """
    j = pl.program_id(1)

    @pl.when(j == 0)
    def _init():
        acc_ref[...] = jnp.zeros_like(acc_ref)

    # First linear (partial over this H tile): (tm, F_p) @ (F_p, th) -> f32.
    x_bf = x_ref[...].astype(jnp.bfloat16)   # VPU cast, hidden under the MXU
    h = jnp.dot(x_bf, w1_ref[...], preferred_element_type=jnp.float32)
    h = h + b1_ref[...]

    # GELU in f32 (v5e VPU/EUP have no bf16 path).
    if approximate_gelu:
        # tanh approximation -> EUP slot (essentially free under the MXU).
        h = jax.nn.gelu(h, approximate=True)
    else:
        # Exact erf GELU: matches torch.nn.GELU() default.
        h = 0.5 * h * (1.0 + jax.lax.erf(h * _INV_SQRT2))

    # TODO(synk): dropout is identity here (eval semantics); training-mode
    # stochastic dropout would need pltpu.prng_* inside the kernel.

    # Second linear partial: (tm, th) @ (th, F_p) -> accumulate in f32.
    acc_ref[...] += jnp.dot(h.astype(w2_ref.dtype), w2_ref[...],
                            preferred_element_type=jnp.float32)

    @pl.when(j == pl.num_programs(1) - 1)
    def _finalize():
        o_ref[...] = (acc_ref[...] + b2_ref[...]).astype(o_ref.dtype)


# ---------------------------------------------------------------------------
# Generation-aware tile / VMEM selection
# ---------------------------------------------------------------------------
@functools.lru_cache(maxsize=1)
def _chip_config():
    """Returns (vmem_capacity_bytes, tm_target, vmem_budget_bytes)."""
    try:
        vmem_cap = int(pltpu.get_tpu_info().vmem_capacity_bytes)
    except Exception:  # conservative fallback (v7x has 64 MiB per TensorCore)
        vmem_cap = 64 * 1024 * 1024
    if vmem_cap >= 96 * 1024 * 1024:
        # v5e / v6e: 128 MiB per TensorCore.  tm=1024 fully amortizes the
        # weight stream on v6e (v5e is compute-bound from ~512 already; the
        # footprint check below shrinks toward that if the budget binds).
        return vmem_cap, 1024, min(vmem_cap - 24 * 2**20, 100 * 2**20)
    # v7x: 64 MiB per TensorCore; leave headroom for Mosaic internal scratch.
    return vmem_cap, 512, min(vmem_cap - 8 * 2**20, 56 * 2**20)


def _vmem_footprint(tm, th, F_p, out_itemsize):
    x_bytes = 2 * tm * F_p * 4                 # f32 x tile, double-buffered
    o_bytes = 2 * tm * F_p * out_itemsize      # output tile, double-buffered
    acc_bytes = tm * F_p * 4                   # f32 accumulator scratch
    w_bytes = 2 * (F_p * th + th * F_p) * 2    # w1 + w2 bf16, double-buffered
    b_bytes = 2 * (th + F_p) * 4               # biases, double-buffered
    return x_bytes + o_bytes + acc_bytes + w_bytes + b_bytes


def _select_tiles(M, F_p, H_p, out_itemsize, tm_target, vmem_budget):
    # Row tile: as large as possible — weights are re-streamed once per M
    # tile, so tm sets the flops/byte of weight traffic.  Multiple of 16
    # keeps bf16 sublane pairs fully packed.
    tm = min(tm_target, _round_up(M, 16))
    tm = max(16, _round_up(tm, 16))
    # Keep >= 2 M tiles when feasible so the "parallel" M axis can shard
    # across both TensorCores on v7x (neutral on 1-TC v5e/v6e).
    if tm >= 512 and _round_up(M, tm) // tm < 2:
        tm = max(256, _round_up((tm + 1) // 2, 16))

    # Hidden tile: largest 128-multiple divisor of H_p that fits the budget.
    # Shrink th before tm: tm drives weight reuse, th only trades VMEM for a
    # few extra grid steps.
    cands = [t for t in (512, 384, 256, 128) if t <= H_p and H_p % t == 0]
    if not cands:
        cands = [128]
    th = cands[-1]
    for cand in cands:
        if _vmem_footprint(tm, cand, F_p, out_itemsize) <= vmem_budget:
            th = cand
            break
    while _vmem_footprint(tm, th, F_p, out_itemsize) > vmem_budget and tm > 16:
        tm = max(16, _round_up(tm // 2, 16))
    return tm, th


# ---------------------------------------------------------------------------
# Parameter prep (hoisted out of the per-call hot path)
# ---------------------------------------------------------------------------
def prepare_params(w1, b1, w2, b2):
    """Pad + cast weights once; store padded bf16 weights / f32 biases.

    w1: (feat_dim, hid_dim), b1: (hid_dim,), w2: (hid_dim, feat_dim),
    b2: (feat_dim,) — weights stored transposed vs PyTorch's (out, in).

    Correctness relies on the padding being exactly zero: zero w1/b1 columns
    give h == 0, gelu(0) == 0, and zero w2 rows / b2 columns contribute
    nothing to the (later sliced-off) padded output columns.
    """
    F, H = w1.shape
    F_p = _round_up(F, 128)
    H_p = _round_up(H, 128)
    w1_p = jnp.pad(w1, ((0, F_p - F), (0, H_p - H))).astype(jnp.bfloat16)
    b1_p = jnp.pad(b1.astype(jnp.float32), (0, H_p - H)).reshape(1, H_p)
    w2_p = jnp.pad(w2, ((0, H_p - H), (0, F_p - F))).astype(jnp.bfloat16)
    b2_p = jnp.pad(b2.astype(jnp.float32), (0, F_p - F)).reshape(1, F_p)
    return w1_p, b1_p, w2_p, b2_p


# ---------------------------------------------------------------------------
# pallas_call wrapper
# ---------------------------------------------------------------------------
@functools.partial(
    jax.jit,
    static_argnames=("tm", "th", "approximate_gelu", "out_dtype", "vmem_limit"))
def _ffn_pallas(x2d, w1_p, b1_p, w2_p, b2_p, *, tm, th, approximate_gelu,
                out_dtype, vmem_limit):
    M, F = x2d.shape
    F_p, H_p = w1_p.shape
    assert F <= F_p and F_p % 128 == 0 and H_p % th == 0

    M_p = _round_up(M, tm)
    x_pad = x2d.astype(jnp.float32)
    if (M_p, F_p) != (M, F):
        x_pad = jnp.pad(x_pad, ((0, M_p - M), (0, F_p - F)))

    grid = (M_p // tm, H_p // th)          # M "parallel", H (reduction) last
    n_m_tiles = grid[0]
    out_itemsize = jnp.dtype(out_dtype).itemsize

    cost = pl.CostEstimate(
        flops=4 * M_p * F_p * H_p,                         # two matmuls
        transcendentals=M_p * H_p,                         # GELU
        bytes_accessed=(
            M_p * F_p * 4                                  # x read (f32)
            + M_p * F_p * out_itemsize                     # output write
            # weights + b1 are re-streamed once per M tile:
            + n_m_tiles * (w1_p.size * 2 + w2_p.size * 2 + b1_p.size * 4)
            + b2_p.size * 4),
    )

    out2d = pl.pallas_call(
        functools.partial(_ffn_kernel, approximate_gelu=approximate_gelu),
        out_shape=jax.ShapeDtypeStruct((M_p, F_p), out_dtype),
        grid_spec=pltpu.PrefetchScalarGridSpec(
            num_scalar_prefetch=0,
            grid=grid,
            in_specs=[
                pl.BlockSpec((tm, F_p), lambda i, j: (i, 0)),   # x row tile
                # Weight specs keep default double buffering; with spare VMEM
                # headroom, pipeline_mode=pl.Buffered(3) on w1/w2 would hide
                # the i-boundary DMA burst (secondary, a few percent).
                pl.BlockSpec((F_p, th), lambda i, j: (0, j)),   # w1 H tile
                pl.BlockSpec((1, th),   lambda i, j: (0, j)),   # b1 H tile
                pl.BlockSpec((th, F_p), lambda i, j: (j, 0)),   # w2 H tile
                pl.BlockSpec((1, F_p),  lambda i, j: (0, 0)),   # b2 invariant
            ],
            out_specs=pl.BlockSpec((tm, F_p), lambda i, j: (i, 0)),
            scratch_shapes=[pltpu.VMEM((tm, F_p), jnp.float32)],
        ),
        compiler_params=pltpu.CompilerParams(
            dimension_semantics=("parallel", "arbitrary"),
            vmem_limit_bytes=vmem_limit,
        ),
        cost_estimate=cost,
    )(x_pad, w1_p, b1_p, w2_p, b2_p)
    return out2d


def feed_forward(x, w1_p, b1_p, w2_p, b2_p, *, tm=None, th=None,
                 approximate_gelu=False, out_dtype=None):
    """x: (..., feat_dim) -> (..., feat_dim). Params from prepare_params()."""
    F = x.shape[-1]
    F_p, H_p = w1_p.shape
    M = int(math.prod(x.shape[:-1])) if x.ndim > 1 else 1
    out_dtype = jnp.dtype(out_dtype) if out_dtype is not None else jnp.dtype(x.dtype)

    _, tm_target, vmem_budget = _chip_config()
    if tm is None or th is None:
        tm_sel, th_sel = _select_tiles(M, F_p, H_p, out_dtype.itemsize,
                                       tm_target, vmem_budget)
        tm = tm if tm is not None else tm_sel
        th = th if th is not None else th_sel

    out2d = _ffn_pallas(x.reshape(M, F), w1_p, b1_p, w2_p, b2_p,
                        tm=int(tm), th=int(th),
                        approximate_gelu=approximate_gelu,
                        out_dtype=out_dtype, vmem_limit=int(vmem_budget))
    return out2d[:M, :F].reshape(*x.shape[:-1], F)


# ---------------------------------------------------------------------------
# Parameter init mirroring the PyTorch module
# ---------------------------------------------------------------------------
def init_params(key, feat_dim, hid_dim):
    """kaiming_normal_(fan_in, relu) weights; default nn.Linear bias init.

    Weights are stored transposed: (in_features, out_features).
    """
    k1, k2, k3, k4 = jax.random.split(key, 4)

    std1 = math.sqrt(2.0 / feat_dim)
    w1 = jax.random.normal(k1, (feat_dim, hid_dim), jnp.float32) * std1
    bound1 = 1.0 / math.sqrt(feat_dim)
    b1 = jax.random.uniform(k2, (hid_dim,), jnp.float32, -bound1, bound1)

    std2 = math.sqrt(2.0 / hid_dim)
    w2 = jax.random.normal(k3, (hid_dim, feat_dim), jnp.float32) * std2
    bound2 = 1.0 / math.sqrt(hid_dim)
    b2 = jax.random.uniform(k4, (feat_dim,), jnp.float32, -bound2, bound2)

    return w1, b1, w2, b2


if __name__ == "__main__":
    batch, seq, feat_dim, hid_dim = 2, 8, 32, 64
    key = jax.random.PRNGKey(0)
    kx, kp = jax.random.split(key)

    x = jax.random.normal(kx, (batch, seq, feat_dim), jnp.float32)
    w1, b1, w2, b2 = init_params(kp, feat_dim, hid_dim)

    params = prepare_params(w1, b1, w2, b2)
    out = feed_forward(x, *params)
    jax.block_until_ready(out)

    # Reference in plain f32 JAX (eval-mode dropout = identity, exact erf GELU).
    # Kernel uses bf16 matmul operands with f32 accumulation -> relaxed tol.
    h_ref = x.reshape(-1, feat_dim) @ w1 + b1
    h_ref = 0.5 * h_ref * (1.0 + jax.lax.erf(h_ref * _INV_SQRT2))
    ref = (h_ref @ w2 + b2).reshape(batch, seq, feat_dim)
    assert out.shape == ref.shape
    assert jnp.allclose(out, ref, atol=3e-2, rtol=3e-2), (
        float(jnp.max(jnp.abs(out - ref))))

    print("KERNEL_OK")
</pallas_src>

<mosaic_0001>
module attributes {stable_mosaic.version = 11 : i64} {
  func.func @_ffn_kernel(%arg0: i32, %arg1: i32, %arg2: memref<16x128xf32, #tpu.memory_space<vmem>>, %arg3: memref<128x128xbf16, #tpu.memory_space<vmem>>, %arg4: memref<1x128xf32, #tpu.memory_space<vmem>>, %arg5: memref<128x128xbf16, #tpu.memory_space<vmem>>, %arg6: memref<1x128xf32, #tpu.memory_space<vmem>>, %arg7: memref<16x128xf32, #tpu.memory_space<vmem>>, %arg8: memref<16x128xf32, #tpu.memory_space<vmem>>) attributes {dimension_semantics = [#tpu.dimension_semantics<parallel>, #tpu.dimension_semantics<arbitrary>], iteration_bounds = array<i64: 1, 1>, scalar_prefetch = 0 : i64, scratch_operands = 1 : i64, tpu.core_type = #tpu.core_type<tc>, window_params = [{transform_indices = @transform_0, window_bounds = array<i64: 16, 128>}, {transform_indices = @transform_1, window_bounds = array<i64: 128, 128>}, {transform_indices = @transform_2, window_bounds = array<i64: 1, 128>}, {transform_indices = @transform_3, window_bounds = array<i64: 128, 128>}, {pipeline_mode = #tpu.pipeline_mode<synchronous>, transform_indices = @transform_4, window_bounds = array<i64: 1, 128>}, {transform_indices = @transform_5, window_bounds = array<i64: 16, 128>}]} {
    %c0_i32 = arith.constant 0 : i32
    %0 = arith.cmpi eq, %arg1, %c0_i32 : i32
    %1 = arith.extui %0 : i1 to i32
    %c0_i32_0 = arith.constant 0 : i32
    %2 = arith.cmpi ne, %1, %c0_i32_0 : i32
    scf.if %2 {
      %cst_18 = arith.constant 0.000000e+00 : f32
      %27 = vector.broadcast %cst_18 : f32 to vector<16x128xf32>
      %c0_19 = arith.constant 0 : index
      %c0_20 = arith.constant 0 : index
      %28 = vector.load %arg8[%c0_19, %c0_20] : memref<16x128xf32, #tpu.memory_space<vmem>>, vector<16x128xf32>
      tpu.vector_store %arg8[%c0_19, %c0_20], %27 {strides = array<i32>} : memref<16x128xf32, #tpu.memory_space<vmem>>, vector<16x128xf32>,
    } else {
    }
    %c0 = arith.constant 0 : index
    %c0_1 = arith.constant 0 : index
    %3 = vector.load %arg2[%c0, %c0_1] : memref<16x128xf32, #tpu.memory_space<vmem>>, vector<16x128xf32>
    %4 = arith.truncf %3 : vector<16x128xf32> to vector<16x128xbf16>
    %c0_2 = arith.constant 0 : index
    %c0_3 = arith.constant 0 : index
    %5 = vector.load %arg3[%c0_2, %c0_3] : memref<128x128xbf16, #tpu.memory_space<vmem>>, vector<128x128xbf16>
    %cst = arith.constant dense<0.000000e+00> : vector<16x128xf32>
    %6 = tpu.matmul %4, %5, %cst {dimension_numbers = #tpu.dot_dimension_numbers<[1], [0], [0], [1], [0, 0, 1, 1], [], []>} : vector<16x128xbf16>, vector<128x128xbf16>, vector<16x128xf32> -> vector<16x128xf32>
    %c0_4 = arith.constant 0 : index
    %c0_5 = arith.constant 0 : index
    %7 = vector.load %arg4[%c0_4, %c0_5] : memref<1x128xf32, #tpu.memory_space<vmem>>, vector<1x128xf32>
    %8 = vector.broadcast %7 : vector<1x128xf32> to vector<16x128xf32>
    %9 = arith.addf %6, %8 : vector<16x128xf32>
    %cst_6 = arith.constant 5.000000e-01 : f32
    %10 = vector.broadcast %cst_6 : f32 to vector<16x128xf32>
    %11 = arith.mulf %10, %9 : vector<16x128xf32>
    %cst_7 = arith.constant 0.707106769 : f32
    %12 = vector.broadcast %cst_7 : f32 to vector<16x128xf32>
    %13 = arith.mulf %9, %12 : vector<16x128xf32>
    %14 = math.erf %13 : vector<16x128xf32>
    %cst_8 = arith.constant 1.000000e+00 : f32
    %15 = vector.broadcast %cst_8 : f32 to vector<16x128xf32>
    %16 = arith.addf %15, %14 : vector<16x128xf32>
    %17 = arith.mulf %11, %16 : vector<16x128xf32>
    %c0_9 = arith.constant 0 : index
    %c0_10 = arith.constant 0 : index
    %18 = vector.load %arg8[%c0_9, %c0_10] : memref<16x128xf32, #tpu.memory_space<vmem>>, vector<16x128xf32>
    %19 = arith.truncf %17 : vector<16x128xf32> to vector<16x128xbf16>
    %c0_11 = arith.constant 0 : index
    %c0_12 = arith.constant 0 : index
    %20 = vector.load %arg5[%c0_11, %c0_12] : memref<128x128xbf16, #tpu.memory_space<vmem>>, vector<128x128xbf16>
    %cst_13 = arith.constant dense<0.000000e+00> : vector<16x128xf32>
    %21 = tpu.matmul %19, %20, %cst_13 {dimension_numbers = #tpu.dot_dimension_numbers<[1], [0], [0], [1], [0, 0, 1, 1], [], []>} : vector<16x128xbf16>, vector<128x128xbf16>, vector<16x128xf32> -> vector<16x128xf32>
    %22 = arith.addf %18, %21 : vector<16x128xf32>
    %c0_14 = arith.constant 0 : index
    %c0_15 = arith.constant 0 : index
    %23 = vector.load %arg8[%c0_14, %c0_15] : memref<16x128xf32, #tpu.memory_space<vmem>>, vector<16x128xf32>
    tpu.vector_store %arg8[%c0_14, %c0_15], %22 {strides = array<i32>} : memref<16x128xf32, #tpu.memory_space<vmem>>, vector<16x128xf32>,
    %c0_i32_16 = arith.constant 0 : i32
    %24 = arith.cmpi eq, %arg1, %c0_i32_16 : i32
    %25 = arith.extui %24 : i1 to i32
    %c0_i32_17 = arith.constant 0 : i32
    %26 = arith.cmpi ne, %25, %c0_i32_17 : i32
    scf.if %26 {
      %c0_18 = arith.constant 0 : index
      %c0_19 = arith.constant 0 : index
      %27 = vector.load %arg8[%c0_18, %c0_19] : memref<16x128xf32, #tpu.memory_space<vmem>>, vector<16x128xf32>
      %c0_20 = arith.constant 0 : index
      %c0_21 = arith.constant 0 : index
      %28 = vector.load %arg6[%c0_20, %c0_21] : memref<1x128xf32, #tpu.memory_space<vmem>>, vector<1x128xf32>
      %29 = vector.broadcast %28 : vector<1x128xf32> to vector<16x128xf32>
      %30 = arith.addf %27, %29 : vector<16x128xf32>
      %c0_22 = arith.constant 0 : index
      %c0_23 = arith.constant 0 : index
      %31 = vector.load %arg7[%c0_22, %c0_23] : memref<16x128xf32, #tpu.memory_space<vmem>>, vector<16x128xf32>
      tpu.vector_store %arg7[%c0_22, %c0_23], %30 {strides = array<i32>} : memref<16x128xf32, #tpu.memory_space<vmem>>, vector<16x128xf32>,
    } else {
    }
    return
  }
  func.func @transform_0(%arg0: i32, %arg1: i32) -> (i32, i32) {
    %c0_i32 = arith.constant 0 : i32
    %c0_i32_0 = arith.constant 0 : i32
    return %arg0, %c0_i32 : i32, i32
  }
  func.func @transform_1(%arg0: i32, %arg1: i32) -> (i32, i32) {
    %c0_i32 = arith.constant 0 : i32
    %c0_i32_0 = arith.constant 0 : i32
    return %c0_i32, %arg1 : i32, i32
  }
  func.func @transform_2(%arg0: i32, %arg1: i32) -> (i32, i32) {
    %c0_i32 = arith.constant 0 : i32
    %c0_i32_0 = arith.constant 0 : i32
    return %c0_i32, %arg1 : i32, i32
  }
  func.func @transform_3(%arg0: i32, %arg1: i32) -> (i32, i32) {
    %c0_i32 = arith.constant 0 : i32
    %c0_i32_0 = arith.constant 0 : i32
    return %arg1, %c0_i32 : i32, i32
  }
  func.func @transform_4(%arg0: i32, %arg1: i32) -> (i32, i32) {
    %c0_i32 = arith.constant 0 : i32
    %c0_i32_0 = arith.constant 0 : i32
    %c0_i32_1 = arith.constant 0 : i32
    return %c0_i32, %c0_i32_0 : i32, i32
  }
  func.func @transform_5(%arg0: i32, %arg1: i32) -> (i32, i32) {
    %c0_i32 = arith.constant 0 : i32
    %c0_i32_0 = arith.constant 0 : i32
    return %arg0, %c0_i32 : i32, i32
  }
}

</mosaic_0001>

<bundles_post_ra>
// kernel: _ffn_pallas.1
= control target key start
LH: loop header
LB: loop body
LE: loop exit
PB: predicated region body
PF: predicated region fallthrough
CT: control target
= control target key end

     0   :  { %10 = vsyncpa [#allocation4], 0  ;;  %s599_s0 = inlined_call_operand.vmem [shape: f32[16,128], index: 0, kind: input, shape index: {}]   ;;  %s600_s1 = inlined_call_operand.hbm [shape: bf16[128,128], index: 1, kind: input, shape index: {}]   ;;  %s601_s2 = inlined_call_operand.vmem [shape: f32[1,128], index: 2, kind: input, shape index: {}]   ;;  %s602_s3 = inlined_call_operand.hbm [shape: bf16[128,128], index: 3, kind: input, shape index: {}]   ;;  %s603_s4 = inlined_call_operand.vmem [shape: f32[1,128], index: 4, kind: input, shape index: {}]   ;;  %s604_s5 = inlined_call_operand.hbm [shape: f32[16,128], index: 5, kind: output, shape index: {}]  }
   0x1   :  { %11 = vsyncpa [#allocation7], 0 }
   0x2   :  { %12 = vsyncpa [#allocation5], 0  ;;  %s19_s20 = sshll.u32 %s600_s1, 4  ;;  %s523_s21 = smov [#allocation3]   ;;  %s20_s20 = int_to_ptr.hbm [resolvable:$true] %s19_s20 }
   0x3   :  { %s21_s22 = sshll.u32 %s523_s21, 4  ;;  %s34_s25 = sshll.u32 %s602_s3, 4  ;;  %s22_s22 = int_to_ptr.vmem [resolvable:$true] %s21_s22  ;;  %s35_s25 = int_to_ptr.hbm [resolvable:$true] %s34_s25 }
   0x4   :  { %s524_s26 = smov 64   ;;  %s525_s27 = smov 4  }
   0x5   :  { %27 = dma.hbm_to_vmem [thread:$0]  %s20_s20, 1024, %s22_s22, [#allocation4], %s524_s26, %s524_s26, %s525_s27  }
   0x6   :  { %s526_s28 = smov [#allocation6]  }
   0x7   :  { %s36_s29 = sshll.u32 %s526_s28, 4  ;;  %s37_s29 = int_to_ptr.vmem [resolvable:$true] %s36_s29 }
   0x8   :  { %42 = dma.hbm_to_vmem [thread:$0]  %s35_s25, 1024, %s37_s29, [#allocation7], %s524_s26, %s524_s26, %s525_s27  }
   0x9   :  { %517 = dma.done.wait [#allocation4], 1024  }
   0xa   :  { %518 = vsyncadd [#allocation4], 4294966272 }
   0xb   :  { %519 = dma.done.wait [#allocation7], 1024  }
   0xc   :  { %520 = vsyncadd [#allocation7], 4294966272  ;;  %v423_v0 = vld [vmem:[#allocation3 + $0x38] sm:$0xff]  ;;  %v422_v1 = vld [vmem:[#allocation3 + $0x30] sm:$0xff]  ;;  %s527_s9 = smov [#allocation8]   ;;  %s336_s13 = sshll.u32 %s604_s5, 4  ;;  %s337_s13 = int_to_ptr.hbm [resolvable:$true] %s336_s13 }
   0xd   :  { %130 = vmatpush.bf16.msra.mxu0 %v423_v0  ;;  %v421_v2 = vld [vmem:[#allocation3 + $0x28] sm:$0xff]  ;;  %v420_v3 = vld [vmem:[#allocation3 + $0x20] sm:$0xff]  ;;  %v419_v4 = vld [vmem:[#allocation3 + $0x18] sm:$0xff]  ;;  %s334_s10 = sshll.u32 %s527_s9, 4  ;;  %s528_s14 = smov 128   ;;  %s335_s10 = int_to_ptr.vmem [resolvable:$true] %s334_s10 }
   0xe   :  { %v418_v5 = vld [vmem:[#allocation3 + $0x10] sm:$0xff]  ;;  %v417_v6 = vld [vmem:[#allocation3 + $0x8] sm:$0xff]  ;;  %v416_v7 = vld [vmem:[#allocation3] sm:$0xff]  ;;  %s529_s15 = smov 8  }
   0xf   :  { %v59_v8 = vld [vmem:[%s599_s0] sm:$0xff]  ;;  %v60_v9 = vld [vmem:[%s599_s0 + $0x8] sm:$0xff]  ;;  %v431_v12 = vld [vmem:[#allocation6 + $0x38] sm:$0xff] }
  0x10   :  { %v61_v10 = vpack.c.bf16 %v60_v9, %v59_v8  ;;  %v439_v11 = vld [vmem:[%s601_s2] ss:$0 sm:$0xff]  ;;  %299 = vmatpush.bf16.msra.mxu1 %v431_v12  ;;  %v430_v16 = vld [vmem:[#allocation6 + $0x30] sm:$0xff]  ;;  %v429_v18 = vld [vmem:[#allocation6 + $0x28] sm:$0xff] }
  0x11   :  { %131 = vmatpush.bf16.msra.mxu0 %v422_v1  ;;  %v428_v23 = vld [vmem:[#allocation6 + $0x20] sm:$0xff]  ;;  %v427_v29 = vld [vmem:[#allocation6 + $0x18] sm:$0xff]  ;;  %v426_v35 = vld [vmem:[#allocation6 + $0x10] sm:$0xff] }
  0x12   :  { %v425_v43 = vld [vmem:[#allocation6 + $0x8] sm:$0xff]  ;;  %v424_v50 = vld [vmem:[#allocation6] sm:$0xff] }
  0x14   :  { %300 = vmatpush.bf16.msra.mxu1 %v430_v16 }
  0x15   :  { %132 = vmatpush.bf16.msra.mxu0 %v421_v2 }
  0x18   :  { %301 = vmatpush.bf16.msra.mxu1 %v429_v18 }
  0x19   :  { %133 = vmatpush.bf16.msra.mxu0 %v420_v3 }
  0x1c   :  { %302 = vmatpush.bf16.msra.mxu1 %v428_v23 }
  0x1d   :  { %134 = vmatpush.bf16.msra.mxu0 %v419_v4 }
  0x20   :  { %303 = vmatpush.bf16.msra.mxu1 %v427_v29 }
  0x21   :  { %135 = vmatpush.bf16.msra.mxu0 %v418_v5 }
  0x24   :  { %304 = vmatpush.bf16.msra.mxu1 %v426_v35 }
  0x25   :  { %136 = vmatpush.bf16.msra.mxu0 %v417_v6 }
  0x28   :  { %305 = vmatpush.bf16.msra.mxu1 %v425_v43 }
  0x29   :  { %137 = vmatpush.bf16.msra.mxu0 %v416_v7 }
  0x2c   :  { %138 = vmatmul.bf16.vlgmr.msra.gmra.mxu0 %v61_v10  ;;  %306 = vmatpush.bf16.msra.mxu1 %v424_v50 }
  0xa9   :  { %v139_v13 = vpop.f32.mrf.mxu0 }
  0xaa   :  { %v575_v14 = vadd.f32 %v439_v11, %v139_v13 }
  0xac   :  { %v578_v15 = vmul.f32 0.70710677, %v575_v14 }
  0xae   :  { %v148_v17 = vmul.f32 %v578_v15, %v578_v15 }
  0xb0   :  { %v149_v19 = vmin.f32 %v148_v17, 16.0 }
  0xb1   :  { %v141_v20 = vpop.f32.mrf.mxu0 }
  0xb2   :  { %v150_v21 = vmul.f32 2.1237322e-06, %v149_v19  ;;  %v582_v22 = vadd.f32 %v439_v11, %v141_v20  ;;  %v161_v24 = vmul.f32 3.8918573e-05, %v149_v19 }
  0xb4   :  { %v151_v25 = vadd.f32 0.00028619796, %v150_v21  ;;  %v585_v26 = vmul.f32 0.70710677, %v582_v22  ;;  %v162_v27 = vadd.f32 0.001143296, %v161_v24 }
  0xb6   :  { %v188_v28 = vmul.f32 %v585_v26, %v585_v26  ;;  %v152_v30 = vmul.f32 %v151_v25, %v149_v19  ;;  %v163_v31 = vmul.f32 %v162_v27, %v149_v19 }
  0xb8   :  { %v189_v32 = vmin.f32 %v188_v28, 16.0  ;;  %v164_v33 = vadd.f32 0.014752088, %v163_v31  ;;  %v153_v37 = vadd.f32 0.0036580483, %v152_v30 }
  0xba   :  { %v190_v34 = vmul.f32 2.1237322e-06, %v189_v32  ;;  %v201_v36 = vmul.f32 3.8918573e-05, %v189_v32  ;;  %v165_v38 = vmul.f32 %v164_v33, %v149_v19  ;;  %v154_v45 = vmul.f32 %v153_v37, %v149_v19 }
  0xbb   :  { %v145_v37 = vmul.f32 0.5, %v582_v22 }
  0xbc   :  { %v191_v39 = vadd.f32 0.00028619796, %v190_v34  ;;  %v202_v40 = vadd.f32 0.001143296, %v201_v36  ;;  %v166_v41 = vadd.f32 0.112945676, %v165_v38 }
  0xbd   :  { %v155_v52 = vadd.f32 0.05243302, %v154_v45  ;;  %v144_v36 = vmul.f32 0.5, %v575_v14 }
  0xbe   :  { %v192_v42 = vmul.f32 %v191_v39, %v189_v32  ;;  %v203_v44 = vmul.f32 %v202_v40, %v189_v32  ;;  %v167_v46 = vmul.f32 %v166_v41, %v149_v19 }
  0xbf   :  { %v156_v58 = vmul.f32 %v155_v52, %v149_v19 }
  0xc0   :  { %v193_v47 = vadd.f32 0.0036580483, %v192_v42  ;;  %v204_v48 = vadd.f32 0.014752088, %v203_v44  ;;  %v168_v49 = vadd.f32 0.4994258, %v167_v46 }
  0xc1   :  { %v157_v62 = vadd.f32 0.18741608, %v156_v58 }
  0xc2   :  { %v205_v51 = vmul.f32 %v204_v48, %v189_v32  ;;  %v169_v53 = vmul.f32 %v168_v49, %v149_v19  ;;  %v194_v54 = vmul.f32 %v193_v47, %v189_v32 }
  0xc3   :  { %v158_v3 = vmul.f32 %v157_v62, %v149_v19 }
  0xc4   :  { %v206_v55 = vadd.f32 0.112945676, %v205_v51  ;;  %v170_v56 = vadd.f32 1.0, %v169_v53  ;;  %v195_v59 = vadd.f32 0.05243302, %v194_v54 }
  0xc5   :  { %v159_v9 = vadd.f32 1.1283791, %v158_v3 }
  0xc6   :  { %v207_v57 = vmul.f32 %v206_v55, %v189_v32  ;;  %441 = vrcp.f32 %v170_v56  ;;  %v196_v63 = vmul.f32 %v195_v59, %v189_v32  ;;  %v182_v6 = vand.u32 2147483648, %v170_v56 }
  0xc7   :  { %v180_v8 = vand.u32 2147483647, %v170_v56  ;;  %vm176_vm1 = vweird.f32 %v170_v56  ;;  %v160_v18 = vmul.f32 %v159_v9, %v578_v15 }
  0xc8   :  { %v208_v60 = vadd.f32 0.4994258, %v207_v57  ;;  %v197_v4 = vadd.f32 0.18741608, %v196_v63  ;;  %v183_v13 = vor.u32 1.1754944e-38, %v182_v6 }
  0xc9   :  { %vm181_vm3 = vcmp.eq.f32.partialorder %v180_v8, 8.507059e+37 }
  0xca   :  { %v209_v61 = vmul.f32 %v208_v60, %v189_v32  ;;  %v198_v11 = vmul.f32 %v197_v4, %v189_v32 }
  0xcc   :  { %v210_v0 = vadd.f32 1.0, %v209_v61  ;;  %v442_v1 = vpop.eup %441  ;;  %v199_v21 = vadd.f32 1.1283791, %v198_v11 }
  0xcd   :  { %v172_v2 = vmul.f32 %v442_v1, %v170_v56  ;;  %vm177_vm0 = vweird.f32 %v442_v1 }
  0xce   :  { %443 = vrcp.f32 %v210_v0  ;;  %vm178_vm2 = vmor %vm176_vm1, %vm177_vm0  ;;  %v222_v23 = vand.u32 2147483648, %v210_v0  ;;  %v220_v27 = vand.u32 2147483647, %v210_v0  ;;  %vm216_vm5 = vweird.f32 %v210_v0 }
  0xcf   :  { %v173_v5 = vsub.f32 1.0, %v172_v2  ;;  %v200_v30 = vmul.f32 %v199_v21, %v585_v26  ;;  %v440_v26 = vld [vmem:[%s603_s4] ss:$0 sm:$0xff] }
  0xd0   :  { %v223_v29 = vor.u32 1.1754944e-38, %v222_v23  ;;  %vm221_vm7 = vcmp.eq.f32.partialorder %v220_v27, 8.507059e+37 }
  0xd1   :  { %v174_v7 = vmul.f32 %v442_v1, %v173_v5 }
  0xd3   :  { %v175_v12 = vadd.f32 %v442_v1, %v174_v7 }
  0xd4   :  { %v444_v10 = vpop.eup %443 }
  0xd5   :  { %v212_v16 = vmul.f32 %v444_v10, %v210_v0  ;;  %v179_v17 = vsel %vm178_vm2, %v442_v1, %v175_v12  ;;  %vm217_vm4 = vweird.f32 %v444_v10 }
  0xd6   :  { %v184_v20 = vsel %vm181_vm3, %v183_v13, %v179_v17  ;;  %vm218_vm6 = vmor %vm216_vm5, %vm217_vm4 }
  0xd7   :  { %v213_v19 = vsub.f32 1.0, %v212_v16  ;;  %v185_v24 = vmul.f32 %v184_v20, %v160_v18 }
  0xd9   :  { %v214_v25 = vmul.f32 %v444_v10, %v213_v19  ;;  %v382_v31 = vclamps-f32 %v185_v24, 1.0 }
  0xdb   :  { %v215_v28 = vadd.f32 %v444_v10, %v214_v25  ;;  %v228_v35 = vadd.f32 1.0, %v382_v31 }
  0xdd   :  { %v219_v32 = vsel %vm218_vm6, %v444_v10, %v215_v28  ;;  %v230_v39 = vmul.f32 %v228_v35, %v144_v36 }
  0xde   :  { %v224_v33 = vsel %vm221_vm7, %v223_v29, %v219_v32 }
  0xdf   :  { %v225_v34 = vmul.f32 %v224_v33, %v200_v30 }
  0xe1   :  { %v383_v15 = vclamps-f32 %v225_v34, 1.0 }
  0xe3   :  { %v229_v38 = vadd.f32 1.0, %v383_v15 }
  0xe5   :  { %v231_v40 = vmul.f32 %v229_v38, %v145_v37 }
  0xe7   :  { %v234_v41 = vpack.c.bf16 %v231_v40, %v230_v39 }
  0xe9   :  { %307 = vmatmul.bf16.vlgmr.msra.gmra.mxu1 %v234_v41 }
 0x166   :  { %v308_v42 = vpop.f32.mrf.mxu1 }
 0x167   :  { %v326_v43 = vadd.f32 %v440_v26, %v308_v42 }
 0x169   :  { %328 = vst [vmem:[#allocation8] sm:$0xff] %v326_v43 }
 0x16e   :  { %v310_v14 = vpop.f32.mrf.mxu1 }
 0x16f   :  { %v327_v22 = vadd.f32 %v440_v26, %v310_v14 }
 0x171   :  { %329 = vst [vmem:[#allocation8 + $0x8] sm:$0xff] %v327_v22 }
 0x172   :  { %342 = dma.vmem_to_hbm [thread:$0]  %s335_s10, 256, %s337_s13, [#allocation5], %s528_s14, %s528_s14, %s529_s15  }
 0x173   :  { %521 = dma.done.wait [#allocation5], 256  }
 0x174   :  { %522 = vsyncadd [#allocation5], 4294967040 }
 0x175   :  { %347 = vsyncpa [#allocation4], 1 }
 0x176   :  { %348 = vsyncpa [#allocation7], 1 }
 0x177   :  { %349 = vsyncpa [#allocation5], 1 }

</bundles_post_ra>
